<compile_context>
chip_gen: v7x
topology: tpu7x:2x2x1
jax: 0.10.0
libtpu: 0.0.40
codegen_flags: <defaults>
</compile_context>

<pallas_src>
import math
import functools

import jax
import jax.numpy as jnp
from jax import lax
from jax.experimental import pallas as pl
from jax.experimental.pallas import tpu as pltpu

LN_EPS = 1e-5  # torch.nn.LayerNorm default


def _round_up(x, m):
    return ((x + m - 1) // m) * m


def _layernorm(x, gamma, beta):
    mean = jnp.mean(x, axis=-1, keepdims=True)
    var = jnp.mean(jnp.square(x - mean), axis=-1, keepdims=True)
    return (x - mean) * lax.rsqrt(var + LN_EPS) * gamma + beta


def _gelu_exact(x):
    # torch.nn.GELU() default is the exact (erf) formulation.
    return 0.5 * x * (1.0 + lax.erf(x * (1.0 / math.sqrt(2.0))))


def encoder_mlp_kernel(inp_ref, w1_ref, w2_ref, w5_ref, scal_ref, out_ref):
    hidden = w2_ref.shape[1]
    latent_pad = out_ref.shape[1]

    # Stacked bias / LayerNorm parameters: one (8, W) f32 tile.
    scal = scal_ref[...]
    b1 = scal[0:1, :hidden]
    g1 = scal[1:2, :hidden]
    be1 = scal[2:3, :hidden]
    b2 = scal[3:4, :hidden]
    g2 = scal[4:5, :hidden]
    be2 = scal[5:6, :hidden]
    b5 = scal[6:7, :latent_pad]

    # ---- layer1: Linear(concat([x, onehot])) -> LayerNorm -> GELU ----------
    # K is already the concatenated (and zero-padded) state+one-hot axis.
    h = jnp.dot(inp_ref[...], w1_ref[...],
                preferred_element_type=jnp.float32) + b1
    h = _gelu_exact(_layernorm(h, g1, be1))

    # ---- layer2: Linear -> LayerNorm -> GELU --------------------------------
    h = jnp.dot(h.astype(w2_ref.dtype), w2_ref[...],
                preferred_element_type=jnp.float32) + b2
    h = _gelu_exact(_layernorm(h, g2, be2))

    # ---- layer5: Linear (output lanes padded to a multiple of 128) ----------
    y = jnp.dot(h.astype(w5_ref.dtype), w5_ref[...],
                preferred_element_type=jnp.float32) + b5
    out_ref[...] = y.astype(out_ref.dtype)


@functools.partial(jax.jit, static_argnames=("block_b",))
def encoder_mlp(x, one_hot, params, block_b=1024):
    """x: (B, dim_state) f32, one_hot: (B, n_primitives) f32 -> (B, latent) f32."""
    B, dim_state = x.shape
    n_prim = one_hot.shape[1]
    hidden = params["w2"].shape[0]
    latent = params["w5"].shape[1]
    latent_pad = _round_up(latent, 128)
    scal_w = max(hidden, latent_pad)

    # Concatenated input feature axis, padded for bf16 sublane packing.
    K = dim_state + n_prim
    K_pad = _round_up(K, 16)

    # Balanced batch tiling.  Force >= 2 grid steps for moderate/large B so a
    # v7x megacore chip can shard the ("parallel",) batch axis across both
    # TensorCores; tiles are sized so the last one is never mostly padding.
    num_tiles = int(pl.cdiv(B, block_b))
    if B >= 16:
        num_tiles = max(num_tiles, 2)
    tb = _round_up(int(pl.cdiv(B, num_tiles)), 8)
    b_pad = tb * num_tiles

    # Activations: single concatenated bf16 input (one matmul in the kernel).
    inp = jnp.concatenate([x, one_hot], axis=1).astype(jnp.bfloat16)
    inp = jnp.pad(inp, ((0, b_pad - B), (0, K_pad - K)))

    # Weights to bf16 for the MXU; zero-pad K rows / latent lanes.
    w1 = jnp.concatenate([params["w1_state"], params["w1_prim"]], axis=0)
    w1 = jnp.pad(w1, ((0, K_pad - K), (0, 0))).astype(jnp.bfloat16)
    w2 = params["w2"].astype(jnp.bfloat16)
    w5 = jnp.pad(params["w5"],
                 ((0, 0), (0, latent_pad - latent))).astype(jnp.bfloat16)

    # Stack all small per-feature parameters into one (8, scal_w) f32 array.
    scal = jnp.zeros((8, scal_w), jnp.float32)
    scal = scal.at[0, :hidden].set(params["b1"].reshape(-1))
    scal = scal.at[1, :hidden].set(params["g1"].reshape(-1))
    scal = scal.at[2, :hidden].set(params["be1"].reshape(-1))
    scal = scal.at[3, :hidden].set(params["b2"].reshape(-1))
    scal = scal.at[4, :hidden].set(params["g2"].reshape(-1))
    scal = scal.at[5, :hidden].set(params["be2"].reshape(-1))
    scal = scal.at[6, :latent].set(params["b5"].reshape(-1))

    matmul_flops = 2 * b_pad * (K_pad * hidden + hidden * hidden
                                + hidden * latent_pad)
    cost = pl.CostEstimate(
        flops=matmul_flops,
        transcendentals=2 * b_pad * hidden,          # two GELU(erf) layers
        bytes_accessed=(b_pad * K_pad * 2            # bf16 input
                        + (K_pad * hidden + hidden * hidden
                           + hidden * latent_pad) * 2  # bf16 weights
                        + 8 * scal_w * 4             # f32 scalars
                        + b_pad * latent_pad * 4),   # f32 output
    )

    def batch_spec(shape):
        return pl.BlockSpec(shape, lambda i: (i, 0))

    def const_spec(shape):
        return pl.BlockSpec(shape, lambda i: (0, 0))

    out = pl.pallas_call(
        encoder_mlp_kernel,
        out_shape=jax.ShapeDtypeStruct((b_pad, latent_pad), jnp.float32),
        grid=(num_tiles,),
        in_specs=[
            batch_spec((tb, K_pad)),               # concatenated input
            const_spec((K_pad, hidden)),           # w1 (state + prim rows)
            const_spec((hidden, hidden)),          # w2
            const_spec((hidden, latent_pad)),      # w5 (lane-padded)
            const_spec((8, scal_w)),               # stacked biases / LN params
        ],
        out_specs=batch_spec((tb, latent_pad)),
        compiler_params=pltpu.CompilerParams(
            dimension_semantics=("parallel",),
        ),
        cost_estimate=cost,
    )(inp, w1, w2, w5, scal)

    return out[:B, :latent]


def init_encoder_params(key, dim_state, n_primitives, latent_space_dim=64,
                        hidden_size=256, multi_motion=True):
    """Deterministic synthetic parameter init (torch-like uniform bounds)."""
    input_dim = dim_state + n_primitives if multi_motion else dim_state
    ks = jax.random.split(key, 6)

    def linear(kw, kb, fan_in, fan_out):
        bound = 1.0 / math.sqrt(fan_in)
        w = jax.random.uniform(kw, (fan_in, fan_out), jnp.float32, -bound, bound)
        b = jax.random.uniform(kb, (1, fan_out), jnp.float32, -bound, bound)
        return w, b

    w1, b1 = linear(ks[0], ks[1], input_dim, hidden_size)
    if multi_motion:
        w1_state, w1_prim = w1[:dim_state], w1[dim_state:]
    else:
        w1_state = w1
        w1_prim = jnp.zeros((n_primitives, hidden_size), jnp.float32)
    w2, b2 = linear(ks[2], ks[3], hidden_size, hidden_size)
    w5, b5 = linear(ks[4], ks[5], hidden_size, latent_space_dim)

    return {
        "w1_state": w1_state, "w1_prim": w1_prim, "b1": b1,
        "g1": jnp.ones((1, hidden_size), jnp.float32),
        "be1": jnp.zeros((1, hidden_size), jnp.float32),
        "w2": w2, "b2": b2,
        "g2": jnp.ones((1, hidden_size), jnp.float32),
        "be2": jnp.zeros((1, hidden_size), jnp.float32),
        "w5": w5, "b5": b5,
    }


def _make_one_hot(x_t, primitive_type, n_primitives, multi_motion):
    if not multi_motion:
        return jnp.zeros((x_t.shape[0], n_primitives), x_t.dtype)
    if primitive_type.ndim == 1:
        return jax.nn.one_hot(primitive_type.astype(jnp.int32), n_primitives,
                              dtype=x_t.dtype)
    if primitive_type.ndim == 2:
        return primitive_type.astype(x_t.dtype)
    raise ValueError("primitive_type must be (B,) ids or (B, n_primitives)")


def encoder_forward(x_t, primitive_type, params, n_primitives,
                    multi_motion=True, block_b=1024):
    """Mirrors Encoder.forward (multi_motion path: state + primitive one-hot)."""
    one_hot = _make_one_hot(x_t, primitive_type, n_primitives, multi_motion)
    return encoder_mlp(x_t, one_hot, params, block_b=block_b)


def encoder_forward_ref(x_t, primitive_type, params, n_primitives,
                        multi_motion=True):
    """Pure-JAX reference with the same bf16-matmul / f32-elementwise recipe."""
    one_hot = _make_one_hot(x_t, primitive_type, n_primitives, multi_motion)
    bf = jnp.bfloat16
    inp = jnp.concatenate([x_t, one_hot], axis=1)
    w1 = jnp.concatenate([params["w1_state"], params["w1_prim"]], axis=0)
    h = jnp.dot(inp.astype(bf), w1.astype(bf),
                preferred_element_type=jnp.float32) + params["b1"]
    h = _gelu_exact(_layernorm(h, params["g1"], params["be1"]))
    h = jnp.dot(h.astype(bf), params["w2"].astype(bf),
                preferred_element_type=jnp.float32) + params["b2"]
    h = _gelu_exact(_layernorm(h, params["g2"], params["be2"]))
    return jnp.dot(h.astype(bf), params["w5"].astype(bf),
                   preferred_element_type=jnp.float32) + params["b5"]


# TODO(synk): update_goals_latent_space / get_goals_latent_space_batch are
# host-side buffer bookkeeping (not part of the forward compute) and are not
# translated to Pallas.

if __name__ == "__main__":
    dim_state = 32
    n_primitives = 4
    latent_space_dim = 64
    hidden_size = 256
    multi_motion = True

    key = jax.random.PRNGKey(0)
    k_params, k_x, k_p, k_x2, k_p2 = jax.random.split(key, 5)

    params = init_encoder_params(
        k_params, dim_state, n_primitives, latent_space_dim, hidden_size,
        multi_motion)

    # Small case (single tile).
    B = 8
    x_t = jax.random.normal(k_x, (B, dim_state), jnp.float32)
    primitive_type = jax.random.randint(k_p, (B,), 0, n_primitives, jnp.int32)
    y = encoder_forward(x_t, primitive_type, params, n_primitives, multi_motion)
    y = jax.block_until_ready(y)
    y_ref = encoder_forward_ref(x_t, primitive_type, params, n_primitives,
                                multi_motion)
    assert y.shape == (B, latent_space_dim)
    assert jnp.allclose(y, y_ref, atol=1e-2, rtol=1e-2), "mismatch (B=8)"

    # Non-multiple batch (exercises the 2-tile / balanced-padding path).
    B2 = 300
    x_t2 = jax.random.normal(k_x2, (B2, dim_state), jnp.float32)
    primitive_type2 = jax.random.randint(k_p2, (B2,), 0, n_primitives, jnp.int32)
    y2 = encoder_forward(x_t2, primitive_type2, params, n_primitives, multi_motion)
    y2 = jax.block_until_ready(y2)
    y2_ref = encoder_forward_ref(x_t2, primitive_type2, params, n_primitives,
                                 multi_motion)
    assert y2.shape == (B2, latent_space_dim)
    assert jnp.allclose(y2, y2_ref, atol=1e-2, rtol=1e-2), "mismatch (B=300)"

    print("KERNEL_OK")
</pallas_src>

<mosaic_0001>
module attributes {stable_mosaic.version = 11 : i64} {
  func.func @encoder_mlp_kernel(%arg0: i32, %arg1: memref<8x48xbf16, #tpu.memory_space<vmem>>, %arg2: memref<48x256xbf16, #tpu.memory_space<vmem>>, %arg3: memref<256x256xbf16, #tpu.memory_space<vmem>>, %arg4: memref<256x128xbf16, #tpu.memory_space<vmem>>, %arg5: memref<8x256xf32, #tpu.memory_space<vmem>>, %arg6: memref<8x128xf32, #tpu.memory_space<vmem>>) attributes {dimension_semantics = [#tpu.dimension_semantics<parallel>], iteration_bounds = array<i64: 1>, scalar_prefetch = 0 : i64, scratch_operands = 0 : i64, tpu.core_type = #tpu.core_type<tc>, window_params = [{transform_indices = @transform_0, window_bounds = array<i64: 8, 48>}, {pipeline_mode = #tpu.pipeline_mode<synchronous>, transform_indices = @transform_1, window_bounds = array<i64: 48, 256>}, {pipeline_mode = #tpu.pipeline_mode<synchronous>, transform_indices = @transform_2, window_bounds = array<i64: 256, 256>}, {pipeline_mode = #tpu.pipeline_mode<synchronous>, transform_indices = @transform_3, window_bounds = array<i64: 256, 128>}, {pipeline_mode = #tpu.pipeline_mode<synchronous>, transform_indices = @transform_4, window_bounds = array<i64: 8, 256>}, {transform_indices = @transform_5, window_bounds = array<i64: 8, 128>}]} {
    %c0 = arith.constant 0 : index
    %c0_0 = arith.constant 0 : index
    %0 = vector.load %arg5[%c0, %c0_0] : memref<8x256xf32, #tpu.memory_space<vmem>>, vector<8x256xf32>
    %1 = vector.extract_strided_slice %0 {offsets = [0, 0], sizes = [1, 256], strides = [1, 1]} : vector<8x256xf32> to vector<1x256xf32>
    %2 = vector.extract_strided_slice %0 {offsets = [1, 0], sizes = [1, 256], strides = [1, 1]} : vector<8x256xf32> to vector<1x256xf32>
    %3 = vector.extract_strided_slice %0 {offsets = [2, 0], sizes = [1, 256], strides = [1, 1]} : vector<8x256xf32> to vector<1x256xf32>
    %4 = vector.extract_strided_slice %0 {offsets = [3, 0], sizes = [1, 256], strides = [1, 1]} : vector<8x256xf32> to vector<1x256xf32>
    %5 = vector.extract_strided_slice %0 {offsets = [4, 0], sizes = [1, 256], strides = [1, 1]} : vector<8x256xf32> to vector<1x256xf32>
    %6 = vector.extract_strided_slice %0 {offsets = [5, 0], sizes = [1, 256], strides = [1, 1]} : vector<8x256xf32> to vector<1x256xf32>
    %7 = vector.extract_strided_slice %0 {offsets = [6, 0], sizes = [1, 128], strides = [1, 1]} : vector<8x256xf32> to vector<1x128xf32>
    %c0_1 = arith.constant 0 : index
    %c0_2 = arith.constant 0 : index
    %8 = vector.load %arg1[%c0_1, %c0_2] : memref<8x48xbf16, #tpu.memory_space<vmem>>, vector<8x48xbf16>
    %c0_3 = arith.constant 0 : index
    %c0_4 = arith.constant 0 : index
    %9 = vector.load %arg2[%c0_3, %c0_4] : memref<48x256xbf16, #tpu.memory_space<vmem>>, vector<48x256xbf16>
    %cst = arith.constant dense<0.000000e+00> : vector<8x256xf32>
    %10 = tpu.matmul %8, %9, %cst {dimension_numbers = #tpu.dot_dimension_numbers<[1], [0], [0], [1], [0, 0, 1, 1], [], []>} : vector<8x48xbf16>, vector<48x256xbf16>, vector<8x256xf32> -> vector<8x256xf32>
    %11 = vector.broadcast %1 : vector<1x256xf32> to vector<8x256xf32>
    %12 = arith.addf %10, %11 : vector<8x256xf32>
    %cst_5 = arith.constant dense<0.000000e+00> : vector<8xf32>
    %13 = vector.multi_reduction <add>, %12, %cst_5 [1] : vector<8x256xf32> to vector<8xf32>
    %14 = vector.shape_cast %13 : vector<8xf32> to vector<8x1xf32>
    %cst_6 = arith.constant 2.560000e+02 : f32
    %15 = vector.broadcast %cst_6 : f32 to vector<8x1xf32>
    %16 = arith.divf %14, %15 : vector<8x1xf32>
    %17 = vector.broadcast %16 : vector<8x1xf32> to vector<8x256xf32>
    %18 = arith.subf %12, %17 : vector<8x256xf32>
    %19 = arith.mulf %18, %18 : vector<8x256xf32>
    %cst_7 = arith.constant dense<0.000000e+00> : vector<8xf32>
    %20 = vector.multi_reduction <add>, %19, %cst_7 [1] : vector<8x256xf32> to vector<8xf32>
    %21 = vector.shape_cast %20 : vector<8xf32> to vector<8x1xf32>
    %cst_8 = arith.constant 2.560000e+02 : f32
    %22 = vector.broadcast %cst_8 : f32 to vector<8x1xf32>
    %23 = arith.divf %21, %22 : vector<8x1xf32>
    %24 = vector.broadcast %16 : vector<8x1xf32> to vector<8x256xf32>
    %25 = arith.subf %12, %24 : vector<8x256xf32>
    %cst_9 = arith.constant 9.99999974E-6 : f32
    %26 = vector.broadcast %cst_9 : f32 to vector<8x1xf32>
    %27 = arith.addf %23, %26 : vector<8x1xf32>
    %28 = math.rsqrt %27 : vector<8x1xf32>
    %29 = vector.broadcast %28 : vector<8x1xf32> to vector<8x256xf32>
    %30 = arith.mulf %25, %29 : vector<8x256xf32>
    %31 = vector.broadcast %2 : vector<1x256xf32> to vector<8x256xf32>
    %32 = arith.mulf %30, %31 : vector<8x256xf32>
    %33 = vector.broadcast %3 : vector<1x256xf32> to vector<8x256xf32>
    %34 = arith.addf %32, %33 : vector<8x256xf32>
    %cst_10 = arith.constant 5.000000e-01 : f32
    %35 = vector.broadcast %cst_10 : f32 to vector<8x256xf32>
    %36 = arith.mulf %35, %34 : vector<8x256xf32>
    %cst_11 = arith.constant 0.707106769 : f32
    %37 = vector.broadcast %cst_11 : f32 to vector<8x256xf32>
    %38 = arith.mulf %34, %37 : vector<8x256xf32>
    %39 = math.erf %38 : vector<8x256xf32>
    %cst_12 = arith.constant 1.000000e+00 : f32
    %40 = vector.broadcast %cst_12 : f32 to vector<8x256xf32>
    %41 = arith.addf %40, %39 : vector<8x256xf32>
    %42 = arith.mulf %36, %41 : vector<8x256xf32>
    %43 = arith.truncf %42 : vector<8x256xf32> to vector<8x256xbf16>
    %c0_13 = arith.constant 0 : index
    %c0_14 = arith.constant 0 : index
    %44 = vector.load %arg3[%c0_13, %c0_14] : memref<256x256xbf16, #tpu.memory_space<vmem>>, vector<256x256xbf16>
    %cst_15 = arith.constant dense<0.000000e+00> : vector<8x256xf32>
    %45 = tpu.matmul %43, %44, %cst_15 {dimension_numbers = #tpu.dot_dimension_numbers<[1], [0], [0], [1], [0, 0, 1, 1], [], []>} : vector<8x256xbf16>, vector<256x256xbf16>, vector<8x256xf32> -> vector<8x256xf32>
    %46 = vector.broadcast %4 : vector<1x256xf32> to vector<8x256xf32>
    %47 = arith.addf %45, %46 : vector<8x256xf32>
    %cst_16 = arith.constant dense<0.000000e+00> : vector<8xf32>
    %48 = vector.multi_reduction <add>, %47, %cst_16 [1] : vector<8x256xf32> to vector<8xf32>
    %49 = vector.shape_cast %48 : vector<8xf32> to vector<8x1xf32>
    %cst_17 = arith.constant 2.560000e+02 : f32
    %50 = vector.broadcast %cst_17 : f32 to vector<8x1xf32>
    %51 = arith.divf %49, %50 : vector<8x1xf32>
    %52 = vector.broadcast %51 : vector<8x1xf32> to vector<8x256xf32>
    %53 = arith.subf %47, %52 : vector<8x256xf32>
    %54 = arith.mulf %53, %53 : vector<8x256xf32>
    %cst_18 = arith.constant dense<0.000000e+00> : vector<8xf32>
    %55 = vector.multi_reduction <add>, %54, %cst_18 [1] : vector<8x256xf32> to vector<8xf32>
    %56 = vector.shape_cast %55 : vector<8xf32> to vector<8x1xf32>
    %cst_19 = arith.constant 2.560000e+02 : f32
    %57 = vector.broadcast %cst_19 : f32 to vector<8x1xf32>
    %58 = arith.divf %56, %57 : vector<8x1xf32>
    %59 = vector.broadcast %51 : vector<8x1xf32> to vector<8x256xf32>
    %60 = arith.subf %47, %59 : vector<8x256xf32>
    %cst_20 = arith.constant 9.99999974E-6 : f32
    %61 = vector.broadcast %cst_20 : f32 to vector<8x1xf32>
    %62 = arith.addf %58, %61 : vector<8x1xf32>
    %63 = math.rsqrt %62 : vector<8x1xf32>
    %64 = vector.broadcast %63 : vector<8x1xf32> to vector<8x256xf32>
    %65 = arith.mulf %60, %64 : vector<8x256xf32>
    %66 = vector.broadcast %5 : vector<1x256xf32> to vector<8x256xf32>
    %67 = arith.mulf %65, %66 : vector<8x256xf32>
    %68 = vector.broadcast %6 : vector<1x256xf32> to vector<8x256xf32>
    %69 = arith.addf %67, %68 : vector<8x256xf32>
    %cst_21 = arith.constant 5.000000e-01 : f32
    %70 = vector.broadcast %cst_21 : f32 to vector<8x256xf32>
    %71 = arith.mulf %70, %69 : vector<8x256xf32>
    %cst_22 = arith.constant 0.707106769 : f32
    %72 = vector.broadcast %cst_22 : f32 to vector<8x256xf32>
    %73 = arith.mulf %69, %72 : vector<8x256xf32>
    %74 = math.erf %73 : vector<8x256xf32>
    %cst_23 = arith.constant 1.000000e+00 : f32
    %75 = vector.broadcast %cst_23 : f32 to vector<8x256xf32>
    %76 = arith.addf %75, %74 : vector<8x256xf32>
    %77 = arith.mulf %71, %76 : vector<8x256xf32>
    %78 = arith.truncf %77 : vector<8x256xf32> to vector<8x256xbf16>
    %c0_24 = arith.constant 0 : index
    %c0_25 = arith.constant 0 : index
    %79 = vector.load %arg4[%c0_24, %c0_25] : memref<256x128xbf16, #tpu.memory_space<vmem>>, vector<256x128xbf16>
    %cst_26 = arith.constant dense<0.000000e+00> : vector<8x128xf32>
    %80 = tpu.matmul %78, %79, %cst_26 {dimension_numbers = #tpu.dot_dimension_numbers<[1], [0], [0], [1], [0, 0, 1, 1], [], []>} : vector<8x256xbf16>, vector<256x128xbf16>, vector<8x128xf32> -> vector<8x128xf32>
    %81 = vector.broadcast %7 : vector<1x128xf32> to vector<8x128xf32>
    %82 = arith.addf %80, %81 : vector<8x128xf32>
    %c0_27 = arith.constant 0 : index
    %c0_28 = arith.constant 0 : index
    %83 = vector.load %arg6[%c0_27, %c0_28] : memref<8x128xf32, #tpu.memory_space<vmem>>, vector<8x128xf32>
    tpu.vector_store %arg6[%c0_27, %c0_28], %82 {strides = array<i32>} : memref<8x128xf32, #tpu.memory_space<vmem>>, vector<8x128xf32>,
    return
  }
  func.func @transform_0(%arg0: i32) -> (i32, i32) {
    %c0_i32 = arith.constant 0 : i32
    %c0_i32_0 = arith.constant 0 : i32
    return %arg0, %c0_i32 : i32, i32
  }
  func.func @transform_1(%arg0: i32) -> (i32, i32) {
    %c0_i32 = arith.constant 0 : i32
    %c0_i32_0 = arith.constant 0 : i32
    %c0_i32_1 = arith.constant 0 : i32
    return %c0_i32, %c0_i32_0 : i32, i32
  }
  func.func @transform_2(%arg0: i32) -> (i32, i32) {
    %c0_i32 = arith.constant 0 : i32
    %c0_i32_0 = arith.constant 0 : i32
    %c0_i32_1 = arith.constant 0 : i32
    return %c0_i32, %c0_i32_0 : i32, i32
  }
  func.func @transform_3(%arg0: i32) -> (i32, i32) {
    %c0_i32 = arith.constant 0 : i32
    %c0_i32_0 = arith.constant 0 : i32
    %c0_i32_1 = arith.constant 0 : i32
    return %c0_i32, %c0_i32_0 : i32, i32
  }
  func.func @transform_4(%arg0: i32) -> (i32, i32) {
    %c0_i32 = arith.constant 0 : i32
    %c0_i32_0 = arith.constant 0 : i32
    %c0_i32_1 = arith.constant 0 : i32
    return %c0_i32, %c0_i32_0 : i32, i32
  }
  func.func @transform_5(%arg0: i32) -> (i32, i32) {
    %c0_i32 = arith.constant 0 : i32
    %c0_i32_0 = arith.constant 0 : i32
    return %arg0, %c0_i32 : i32, i32
  }
}

</mosaic_0001>

<bundles_post_ra>
// kernel: encoder_mlp.1
= control target key start
LH: loop header
LB: loop body
LE: loop exit
PB: predicated region body
PF: predicated region fallthrough
CT: control target
= control target key end

     0   :  { %v827_v2 = vmov 0   ;;  %vm69_vm0 = vcmask 392192   ;;  %s1068_s0 = inlined_call_operand.vmem [shape: bf16[8,48], index: 0, kind: input, shape index: {}]   ;;  %s1069_s1 = inlined_call_operand.vmem [shape: bf16[48,256], index: 1, kind: input, shape index: {}]   ;;  %s1070_s2 = inlined_call_operand.vmem [shape: bf16[256,256], index: 2, kind: input, shape index: {}]   ;;  %s1071_s3 = inlined_call_operand.vmem [shape: bf16[256,128], index: 3, kind: input, shape index: {}]   ;;  %s1072_s4 = inlined_call_operand.vmem [shape: f32[8,256], index: 4, kind: input, shape index: {}]   ;;  %s1073_s5 = inlined_call_operand.hbm [shape: f32[8,128], index: 5, kind: output, shape index: {}]  }
   0x1   :  { %v718_v0 = vld [vmem:[%s1069_s1 + $0x4] ss:$8 sps:$4 sm:$0xff]   ;;  %v720_v1 = vld [vmem:[%s1069_s1] ss:$8 sps:$4 sm:$0xff]   ;;  %105 = vmatprep.mubr.bf16.mxu0 %v827_v2  ;;  %v721_v3 = vld [vmem:[%s1069_s1 + $0x14] ss:$8 sps:$4 sm:$0xff]  }
   0x2   :  { %73 = vmatprep.subr.bf16.mxu0 %v718_v0  ;;  %v723_v4 = vld [vmem:[%s1069_s1 + $0x10] ss:$8 sps:$4 sm:$0xff]   ;;  %v724_v5 = vld [vmem:[%s1069_s1 + $0x24] ss:$8 sps:$4 sm:$0xff]   ;;  %v726_v6 = vld [vmem:[%s1069_s1 + $0x20] ss:$8 sps:$4 sm:$0xff]  }
   0x3   :  { %74 = vmatpush1.bf16.msra.mxu0 %v720_v1  ;;  %v24_v7 = vld [vmem:[%s1068_s0] sm:$0xf] }
   0x4   :  { %75 = vmatprep.subr.bf16.mxu0 %v721_v3 }
   0x7   :  { %76 = vmatpush1.bf16.msra.mxu0 %v723_v4 }
   0x8   :  { %77 = vmatprep.subr.bf16.mxu0 %v724_v5 }
   0xb   :  { %78 = vmatpush1.bf16.msra.mxu0 %v726_v6 }
   0xe   :  { %645 = vmatmul.mubr.msk.bf16.vlgmr.msra.gmra.mrb[0].mxu0 %vm69_vm0, %v24_v7 }
   0xf   :  { %10 = vsyncpa [#allocation3], 0  ;;  %v31_v8 = vlaneseq  ;;  %v886_v11 = vld [vmem:[%s1072_s4] sm:$0xff]  ;;  %v891_v12 = vld [vmem:[%s1072_s4 + $0x8] sm:$0xff] }
  0x10   :  { %v727_v22 = vld [vmem:[%s1070_s2 + $0x4] ss:$8 sps:$4 sm:$0xff]   ;;  %v729_v23 = vld [vmem:[%s1070_s2] ss:$8 sps:$4 sm:$0xff]   ;;  %v730_v24 = vld [vmem:[%s1070_s2 + $0x14] ss:$8 sps:$4 sm:$0xff]  }
  0x11   :  { %v880_v9 = vshrl.u32 %v31_v8, 7  ;;  %363 = vmatprep.subr.bf16.mxu1 %v727_v22  ;;  %v732_v25 = vld [vmem:[%s1070_s2 + $0x10] ss:$8 sps:$4 sm:$0xff]   ;;  %v733_v26 = vld [vmem:[%s1070_s2 + $0x24] ss:$8 sps:$4 sm:$0xff]  }
  0x12   :  { %364 = vmatpush1.bf16.msra.mxu1 %v729_v23  ;;  %v735_v27 = vld [vmem:[%s1070_s2 + $0x20] ss:$8 sps:$4 sm:$0xff]   ;;  %v736_v28 = vld [vmem:[%s1070_s2 + $0x34] ss:$8 sps:$4 sm:$0xff]   ;;  %v738_v29 = vld [vmem:[%s1070_s2 + $0x30] ss:$8 sps:$4 sm:$0xff]  }
  0x13   :  { %v33_v10 = vsub.s32 0, %v880_v9  ;;  %365 = vmatprep.subr.bf16.mxu1 %v730_v24  ;;  %v739_v30 = vld [vmem:[%s1070_s2 + $0x44] ss:$8 sps:$4 sm:$0xff]   ;;  %v741_v31 = vld [vmem:[%s1070_s2 + $0x40] ss:$8 sps:$4 sm:$0xff]   ;;  %v133_v0 = vsub.s32 1, %v880_v9 }
  0x14   :  { %v742_v32 = vld [vmem:[%s1070_s2 + $0x54] ss:$8 sps:$4 sm:$0xff]   ;;  %v744_v33 = vld [vmem:[%s1070_s2 + $0x50] ss:$8 sps:$4 sm:$0xff]   ;;  %v745_v41 = vld [vmem:[%s1070_s2 + $0x64] ss:$8 sps:$4 sm:$0xff]  }
  0x15   :  { %v34_v13 = vrot.slane %v886_v11, %v33_v10  ;;  %v38_v14 = vrot.slane %v891_v12, %v33_v10  ;;  %v747_v42 = vld [vmem:[%s1070_s2 + $0x60] ss:$8 sps:$4 sm:$0xff]   ;;  %v748_v43 = vld [vmem:[%s1070_s2 + $0x74] ss:$8 sps:$4 sm:$0xff]   ;;  %v750_v44 = vld [vmem:[%s1070_s2 + $0x70] ss:$8 sps:$4 sm:$0xff]   ;;  %v138_v2 = vrot.slane %v891_v12, %v133_v0  ;;  %v134_v3 = vrot.slane %v886_v11, %v133_v0 }
  0x16   :  { %366 = vmatpush1.bf16.msra.mxu1 %v732_v25  ;;  %v751_v45 = vld [vmem:[%s1070_s2 + $0x84] ss:$8 sps:$4 sm:$0xff]   ;;  %v753_v46 = vld [vmem:[%s1070_s2 + $0x80] ss:$8 sps:$4 sm:$0xff]   ;;  %v754_v47 = vld [vmem:[%s1070_s2 + $0x94] ss:$8 sps:$4 sm:$0xff]  }
  0x17   :  { %367 = vmatprep.subr.bf16.mxu1 %v733_v26  ;;  %v756_v48 = vld [vmem:[%s1070_s2 + $0x90] ss:$8 sps:$4 sm:$0xff]   ;;  %v757_v49 = vld [vmem:[%s1070_s2 + $0xa4] ss:$8 sps:$4 sm:$0xff]   ;;  %v759_v50 = vld [vmem:[%s1070_s2 + $0xa0] ss:$8 sps:$4 sm:$0xff]  }
  0x18   :  { %v760_v51 = vld [vmem:[%s1070_s2 + $0xb4] ss:$8 sps:$4 sm:$0xff]   ;;  %v762_v52 = vld [vmem:[%s1070_s2 + $0xb0] ss:$8 sps:$4 sm:$0xff]   ;;  %v763_v53 = vld [vmem:[%s1070_s2 + $0xc4] ss:$8 sps:$4 sm:$0xff]  }
  0x19   :  { %v765_v54 = vld [vmem:[%s1070_s2 + $0xc0] ss:$8 sps:$4 sm:$0xff]   ;;  %v766_v55 = vld [vmem:[%s1070_s2 + $0xd4] ss:$8 sps:$4 sm:$0xff]   ;;  %v768_v56 = vld [vmem:[%s1070_s2 + $0xd0] ss:$8 sps:$4 sm:$0xff]  }
  0x1a   :  { %368 = vmatpush1.bf16.msra.mxu1 %v735_v27  ;;  %v769_v57 = vld [vmem:[%s1070_s2 + $0xe4] ss:$8 sps:$4 sm:$0xff]   ;;  %v771_v58 = vld [vmem:[%s1070_s2 + $0xe0] ss:$8 sps:$4 sm:$0xff]   ;;  %v772_v59 = vld [vmem:[%s1070_s2 + $0xf4] ss:$8 sps:$4 sm:$0xff]  }
  0x1b   :  { %369 = vmatprep.subr.bf16.mxu1 %v736_v28  ;;  %v774_v60 = vld [vmem:[%s1070_s2 + $0xf0] ss:$8 sps:$4 sm:$0xff]   ;;  %v143_v1 = vsub.s32 2, %v880_v9  ;;  %v197_v28 = vsub.s32 3, %v880_v9  ;;  %v422_v0 = vsub.s32 4, %v880_v9 }
  0x1d   :  { %v148_v7 = vrot.slane %v891_v12, %v143_v1  ;;  %v144_v8 = vrot.slane %v886_v11, %v143_v1  ;;  %v432_v1 = vsub.s32 5, %v880_v9 }
  0x1e   :  { %370 = vmatpush1.bf16.msra.mxu1 %v738_v29  ;;  %v198_v29 = vrot.slane %v886_v11, %v197_v28 }
  0x1f   :  { %371 = vmatprep.subr.bf16.mxu1 %v739_v30  ;;  %v202_v30 = vrot.slane %v891_v12, %v197_v28 }
  0x22   :  { %372 = vmatpush1.bf16.msra.mxu1 %v741_v31 }
  0x23   :  { %373 = vmatprep.subr.bf16.mxu1 %v742_v32 }
  0x26   :  { %374 = vmatpush1.bf16.msra.mxu1 %v744_v33 }
  0x27   :  { %375 = vmatprep.subr.bf16.mxu1 %v745_v41 }
  0x2a   :  { %376 = vmatpush1.bf16.msra.mxu1 %v747_v42 }
  0x2b   :  { %377 = vmatprep.subr.bf16.mxu1 %v748_v43 }
  0x2e   :  { %378 = vmatpush1.bf16.msra.mxu1 %v750_v44 }
  0x2f   :  { %379 = vmatprep.subr.bf16.mxu1 %v751_v45  ;;  %v775_v45 = vld [vmem:[%s1071_s3 + $0x40] sm:$0xff]  }
  0x30   :  { %694 = vmatprep.subr.bf16.mxu0 %v775_v45 }
  0x32   :  { %380 = vmatpush1.bf16.msra.mxu1 %v753_v46  ;;  %v776_v46 = vld [vmem:[%s1071_s3] sm:$0xff]  }
  0x33   :  { %381 = vmatprep.subr.bf16.mxu1 %v754_v47  ;;  %695 = vmatpush3.bf16.msra.mxu0 %v776_v46  ;;  %v777_v47 = vld [vmem:[%s1071_s3 + $0x48] sm:$0xff]  }
  0x34   :  { %696 = vmatprep.subr.bf16.mxu0 %v777_v47 }
  0x36   :  { %382 = vmatpush1.bf16.msra.mxu1 %v756_v48  ;;  %v778_v48 = vld [vmem:[%s1071_s3 + $0x8] sm:$0xff]  }
  0x37   :  { %383 = vmatprep.subr.bf16.mxu1 %v757_v49  ;;  %697 = vmatpush3.bf16.msra.mxu0 %v778_v48  ;;  %v779_v49 = vld [vmem:[%s1071_s3 + $0x50] sm:$0xff]  }
  0x38   :  { %698 = vmatprep.subr.bf16.mxu0 %v779_v49 }
  0x3a   :  { %384 = vmatpush1.bf16.msra.mxu1 %v759_v50  ;;  %v780_v50 = vld [vmem:[%s1071_s3 + $0x10] sm:$0xff]  }
  0x3b   :  { %385 = vmatprep.subr.bf16.mxu1 %v760_v51  ;;  %v781_v51 = vld [vmem:[%s1071_s3 + $0x58] sm:$0xff]   ;;  %699 = vmatpush3.bf16.msra.mxu0 %v780_v50 }
  0x3c   :  { %700 = vmatprep.subr.bf16.mxu0 %v781_v51 }
  0x3e   :  { %386 = vmatpush1.bf16.msra.mxu1 %v762_v52  ;;  %v782_v52 = vld [vmem:[%s1071_s3 + $0x18] sm:$0xff]  }
  0x3f   :  { %387 = vmatprep.subr.bf16.mxu1 %v763_v53  ;;  %v783_v53 = vld [vmem:[%s1071_s3 + $0x60] sm:$0xff]   ;;  %701 = vmatpush3.bf16.msra.mxu0 %v782_v52 }
  0x40   :  { %702 = vmatprep.subr.bf16.mxu0 %v783_v53 }
  0x42   :  { %388 = vmatpush1.bf16.msra.mxu1 %v765_v54  ;;  %v784_v54 = vld [vmem:[%s1071_s3 + $0x20] sm:$0xff]  }
  0x43   :  { %389 = vmatprep.subr.bf16.mxu1 %v766_v55  ;;  %v785_v55 = vld [vmem:[%s1071_s3 + $0x68] sm:$0xff]   ;;  %703 = vmatpush3.bf16.msra.mxu0 %v784_v54 }
  0x44   :  { %704 = vmatprep.subr.bf16.mxu0 %v785_v55 }
  0x46   :  { %390 = vmatpush1.bf16.msra.mxu1 %v768_v56  ;;  %v786_v56 = vld [vmem:[%s1071_s3 + $0x28] sm:$0xff]  }
  0x47   :  { %391 = vmatprep.subr.bf16.mxu1 %v769_v57  ;;  %v787_v57 = vld [vmem:[%s1071_s3 + $0x70] sm:$0xff]   ;;  %705 = vmatpush3.bf16.msra.mxu0 %v786_v56 }
  0x48   :  { %706 = vmatprep.subr.bf16.mxu0 %v787_v57 }
  0x4a   :  { %392 = vmatpush1.bf16.msra.mxu1 %v771_v58  ;;  %v788_v58 = vld [vmem:[%s1071_s3 + $0x30] sm:$0xff]  }
  0x4b   :  { %393 = vmatprep.subr.bf16.mxu1 %v772_v59  ;;  %v789_v59 = vld [vmem:[%s1071_s3 + $0x78] sm:$0xff]   ;;  %707 = vmatpush3.bf16.msra.mxu0 %v788_v58 }
  0x4c   :  { %708 = vmatprep.subr.bf16.mxu0 %v789_v59 }
  0x4e   :  { %394 = vmatpush1.bf16.msra.mxu1 %v774_v60  ;;  %v790_v60 = vld [vmem:[%s1071_s3 + $0x38] sm:$0xff]   ;;  %s828_s3 = smov [#allocation2]  }
  0x4f   :  { %709 = vmatpush3.bf16.msra.mxu0 %v790_v60  ;;  %s631_s18 = sshll.u32 %s828_s3, 4  ;;  %s632_s18 = int_to_ptr.vmem [resolvable:$true] %s631_s18 }
  0x50   :  { %s803_s19 = scalar_lea.vmem %s632_s18, 128  ;;  %p808_p1 = scmp.lt.s32.totalorder %s632_s18, %s632_s18 }
  0x51   :  { %p804_p0 = scmp.ne.s32.totalorder %s632_s18, %s803_s19  ;;  %p809_p2 = scmp.lt.s32.totalorder %s803_s19, %s803_s19 }
  0x53   :  { %p810_p3 = por %p809_p2, %p808_p1 }
  0x55   :  { %p811_p4 = pnand %p810_p3, %p804_p0 }
  0xe1   :  { %v107_v15 = vpop.f32.mrb[0].mxu0 }
  0xe2   :  { %v108_v16 = vadd.f32 %v107_v15, %v34_v13  ;;  %v109_v17 = vpop.f32.mrb[1].mxu0 }
  0xe3   :  { %v110_v18 = vadd.f32 %v109_v17, %v38_v14  ;;  %v111_v19 = vpop.f32.mrb[2].mxu0 }
  0xe4   :  { %v112_v20 = vpop.f32.mrb[3].mxu0 }
  0xe5   :  { %v114_v21 = vadd.f32 %v110_v18, %v108_v16 }
  0xe7   :  { %115 = vadd.xlane.f32.xlu0 %v114_v21 }
 0x174   :  { %v116_v34 = vpop.xlane.xlu0 %115 }
 0x175   :  { %v118_v35 = vmul.f32 0.00390625, %v116_v34 }
 0x177   :  { %v119_v36 = vsub.f32 %v108_v16, %v118_v35  ;;  %v120_v37 = vsub.f32 %v110_v18, %v118_v35 }
 0x179   :  { %v121_v38 = vmul.f32 %v119_v36, %v119_v36  ;;  %v122_v39 = vmul.f32 %v120_v37, %v120_v37 }
 0x17b   :  { %v123_v40 = vadd.f32 %v122_v39, %v121_v38 }
 0x17d   :  { %124 = vadd.xlane.f32.xlu0 %v123_v40 }
 0x20a   :  { %v125_v61 = vpop.xlane.xlu0 %124 }
 0x20b   :  { %v126_v62 = vmul.f32 0.00390625, %v125_v61 }
 0x20d   :  { %v127_v63 = vadd.f32 1e-05, %v126_v62 }
 0x20f   :  { %791 = vrsqrt.f32 %v127_v63 }
 0x219   :  { %v792_v4 = vpop.eup %791 }
 0x21a   :  { %v129_v5 = vmul.f32 %v792_v4, %v119_v36  ;;  %v130_v6 = vmul.f32 %v792_v4, %v120_v37 }
 0x21c   :  { %v140_v10 = vmul.f32 %v138_v2, %v130_v6  ;;  %v139_v13 = vmul.f32 %v134_v3, %v129_v5  ;;  %v423_v2 = vrot.slane %v886_v11, %v422_v0  ;;  %v427_v3 = vrot.slane %v891_v12, %v422_v0 }
 0x21e   :  { %v150_v14 = vadd.f32 %v148_v7, %v140_v10  ;;  %v149_v15 = vadd.f32 %v144_v8, %v139_v13  ;;  %v437_v7 = vrot.slane %v891_v12, %v432_v1  ;;  %v433_v8 = vrot.slane %v886_v11, %v432_v1 }
 0x220   :  { %v154_v16 = vmul.f32 0.70710677, %v150_v14  ;;  %v153_v17 = vmul.f32 0.70710677, %v149_v15  ;;  %v152_v20 = vmul.f32 0.5, %v150_v14  ;;  %v151_v22 = vmul.f32 0.5, %v149_v15 }
 0x222   :  { %793 = verf.f32 %v154_v16 }
 0x223   :  { %795 = verf.f32 %v153_v17 }
 0x22c   :  { %v794_v18 = vpop.eup %793 }
 0x22d   :  { %v796_v19 = vpop.eup %795  ;;  %v158_v21 = vadd.f32 1.0, %v794_v18 }
 0x22e   :  { %v157_v23 = vadd.f32 1.0, %v796_v19 }
 0x22f   :  { %v160_v24 = vmul.f32 %v158_v21, %v152_v20 }
 0x230   :  { %v159_v25 = vmul.f32 %v157_v23, %v151_v22 }
 0x231   :  { %v162_v26 = vpack.c.bf16 %v160_v24, %v160_v24 }
 0x232   :  { %v161_v27 = vpack.c.bf16 %v159_v25, %v159_v25 }
 0x233   :  { %395 = vmatprep.mubr.bf16.mxu1 %v162_v26 }
 0x234   :  { %396 = vmatmul.mubr.bf16.vlgmr.msra.gmra.mrb[0].mxu1 %v161_v27  ;;  %v486_v27 = vsub.s32 6, %v880_v9 }
 0x307   :  { %v397_v31 = vpop.f32.mrb[0].mxu1 }
 0x308   :  { %v398_v32 = vadd.f32 %v397_v31, %v198_v29  ;;  %v399_v33 = vpop.f32.mrb[1].mxu1  ;;  %v487_v29 = vrot.slane %v886_v11, %v486_v27 }
 0x309   :  { %v400_v34 = vadd.f32 %v399_v33, %v202_v30  ;;  %v401_v35 = vpop.f32.mrb[2].mxu1 }
 0x30a   :  { %v402_v36 = vpop.f32.mrb[3].mxu1 }
 0x30b   :  { %v404_v37 = vadd.f32 %v400_v34, %v398_v32 }
 0x30d   :  { %405 = vadd.xlane.f32.xlu1 %v404_v37 }
 0x39a   :  { %v406_v38 = vpop.xlane.xlu1 %405 }
 0x39b   :  { %v407_v39 = vmul.f32 0.00390625, %v406_v38 }
 0x39d   :  { %v408_v40 = vsub.f32 %v398_v32, %v407_v39  ;;  %v409_v41 = vsub.f32 %v400_v34, %v407_v39 }
 0x39f   :  { %v410_v42 = vmul.f32 %v408_v40, %v408_v40  ;;  %v411_v43 = vmul.f32 %v409_v41, %v409_v41 }
 0x3a1   :  { %v412_v44 = vadd.f32 %v411_v43, %v410_v42 }
 0x3a3   :  { %413 = vadd.xlane.f32.xlu1 %v412_v44 }
 0x430   :  { %v414_v61 = vpop.xlane.xlu1 %413 }
 0x431   :  { %v415_v62 = vmul.f32 0.00390625, %v414_v61 }
 0x433   :  { %v416_v63 = vadd.f32 1e-05, %v415_v62 }
 0x435   :  { %797 = vrsqrt.f32 %v416_v63 }
 0x43f   :  { %v798_v4 = vpop.eup %797 }
 0x440   :  { %v418_v5 = vmul.f32 %v798_v4, %v408_v40  ;;  %v419_v6 = vmul.f32 %v798_v4, %v409_v41 }
 0x442   :  { %v428_v10 = vmul.f32 %v423_v2, %v418_v5  ;;  %v429_v13 = vmul.f32 %v427_v3, %v419_v6 }
 0x444   :  { %v439_v14 = vadd.f32 %v437_v7, %v429_v13  ;;  %v438_v15 = vadd.f32 %v433_v8, %v428_v10 }
 0x446   :  { %v443_v16 = vmul.f32 0.70710677, %v439_v14  ;;  %v442_v17 = vmul.f32 0.70710677, %v438_v15  ;;  %v441_v20 = vmul.f32 0.5, %v439_v14  ;;  %v440_v22 = vmul.f32 0.5, %v438_v15 }
 0x448   :  { %799 = verf.f32 %v443_v16 }
 0x449   :  { %801 = verf.f32 %v442_v17 }
 0x452   :  { %v800_v18 = vpop.eup %799 }
 0x453   :  { %v802_v19 = vpop.eup %801  ;;  %v447_v21 = vadd.f32 1.0, %v800_v18 }
 0x454   :  { %v446_v23 = vadd.f32 1.0, %v802_v19 }
 0x455   :  { %v449_v24 = vmul.f32 %v447_v21, %v441_v20 }
 0x456   :  { %v448_v25 = vmul.f32 %v446_v23, %v440_v22 }
 0x457   :  { %v451_v26 = vpack.c.bf16 %v449_v24, %v449_v24 }
 0x458   :  { %v450_v12 = vpack.c.bf16 %v448_v25, %v448_v25 }
 0x459   :  { %616 = vmatprep.mubr.bf16.mxu0 %v451_v26 }
 0x45a   :  { %617 = vmatmul.mubr.bf16.vlgmr.msra.gmra.mrb[4].mxu0 %v450_v12 }
 0x52d   :  { %v710_v28 = vpop.f32.mrb[4].mxu0 }
 0x52e   :  { %v711_v30 = vpop.f32.mrb[5].mxu0 }
 0x52f   :  { %v712_v31 = vadd.f32 %v711_v30, %v710_v28  ;;  %v713_v32 = vpop.f32.mrb[6].mxu0 }
 0x530   :  { %v714_v33 = vpop.f32.mrb[7].mxu0 }
 0x531   :  { %v619_v34 = vadd.f32 %v712_v31, %v487_v29 }
 0x533   :  { %624 = vst [vmem:[#allocation2] sm:$0xff] %v619_v34 }
 0x534   :  { %814 = shalt.err (!%p811_p4)
}
 0x535   :  { %s815_s22 = scalar_lea.hbm %s1073_s5, 128 }
 0x536   :  { %p816_p5 = scmp.ne.s32.totalorder %s1073_s5, %s815_s22  ;;  %p819_p6 = scmp.lt.u32.totalorder %s815_s22, %s1073_s5 }
 0x538   :  { %p821_p7 = pnand %p819_p6, %p816_p5 }
 0x53a   :  { %824 = shalt.err (!%p821_p7)
}
 0x53b   :  { %634 = dma.vmem_to_hbm [thread:$0]  %s632_s18, 128, %s1073_s5, [#allocation3]  }
 0x53c   :  { %825 = dma.done.wait [#allocation3], 128  }
 0x53d   :  { %826 = vsyncadd [#allocation3], 4294967168 }
 0x53e   :  { %638 = vsyncpa [#allocation3], 1 }

</bundles_post_ra>
